<compile_context>
chip_gen: v7x
topology: tpu7x:2x2x1
jax: 0.10.0
libtpu: 0.0.40
codegen_flags: <defaults>
</compile_context>

<pallas_src>
import jax
import jax.numpy as jnp
from jax.experimental import pallas as pl
from jax.experimental.pallas import tpu as pltpu

# ----------------------------- configuration --------------------------------
B = 2            # batch (kernel is batch-generic; M is rounded to 8 sublanes by HW)
NUM_JOINT = 8
EMBED_DIM = 32
DEPTH = 2
HIDDEN_MESH = 64
NUM_VERTS = 16

IN_DIM = NUM_JOINT * 2                      # 16  (flattened 2D pose)
POSE3D_DIM = NUM_JOINT * 3                  # 24
FEAT_DIM = NUM_JOINT * EMBED_DIM            # 256
COMBINE_C = 2 + 3 + EMBED_DIM               # 37 per joint
COMBINE_DIM = NUM_JOINT * COMBINE_C         # 296
MESH_DIM = NUM_VERTS * 3                    # 48

LANE = 128
SUB = 16                                    # bf16 sublane packing


def _rup(x, m):
    return (x + m - 1) // m * m


# lane-padded widths
POSE_P = _rup(POSE3D_DIM, LANE)             # 128
HEAD_P = FEAT_DIM + POSE_P                  # 384: merged head = [feat | pose3d | pad]
HIDDEN_P = _rup(HIDDEN_MESH, LANE)          # 128
MESH_P = _rup(MESH_DIM, LANE)               # 128
OUT_SLAB = MESH_P + POSE_P                  # 256: [mesh slab | pose3d slab]

# packed weight-blob row offsets (all multiples of 16 -> bf16 tile aligned)
R_WIN = 0
R_WH = R_WIN + _rup(IN_DIM, SUB)            # 16
WH_BLK = _rup(EMBED_DIM, SUB)               # 32
R_WHEAD = R_WH + DEPTH * WH_BLK             # 80
R_W1_2D = R_WHEAD + _rup(EMBED_DIM, SUB)    # 112
R_W1_HP = R_W1_2D + _rup(IN_DIM, SUB)       # 128
R_W2 = R_W1_HP + HEAD_P                     # 512
W_ROWS = R_W2 + HIDDEN_P                    # 640
W_COLS = HEAD_P                             # 384 (widest weight)

# packed bias-blob rows
BI_IN = 0
BI_H0 = 1
BI_HEAD = 1 + DEPTH                         # 3
BI_1 = 2 + DEPTH                            # 4
BI_2 = 3 + DEPTH                            # 5
B_ROWS = _rup(BI_2 + 1, 8)                  # 8


# ------------------------------ fused kernel ---------------------------------
def graphormer_fused_kernel(x_ref, w_ref, b_ref, out_ref):
    """Fused pose_lifter -> combine -> pose2mesh.

    x_ref:   (B, IN_DIM)        f32  flattened 2D pose
    w_ref:   (W_ROWS, W_COLS)   bf16 packed weights
    b_ref:   (B_ROWS, W_COLS)   f32  packed biases
    out_ref: (B, OUT_SLAB)      f32  lane-dense slab: [mesh(48) pad | pose3d(24) pad]
    """
    x = x_ref[...]
    x16 = x.astype(jnp.bfloat16)                                  # MXU input only

    # ---- pose-lifter trunk (stand-in MLP) ----
    h = jnp.dot(x16, w_ref[R_WIN:R_WIN + IN_DIM, 0:EMBED_DIM],
                preferred_element_type=jnp.float32)
    h = jnp.maximum(h + b_ref[BI_IN:BI_IN + 1, 0:EMBED_DIM], 0.0)  # f32 epilogue
    for d in range(DEPTH):                                         # static unroll
        r = R_WH + d * WH_BLK
        h = jnp.dot(h.astype(jnp.bfloat16),
                    w_ref[r:r + EMBED_DIM, 0:EMBED_DIM],
                    preferred_element_type=jnp.float32)
        h = jnp.maximum(h + b_ref[BI_H0 + d:BI_H0 + d + 1, 0:EMBED_DIM], 0.0)

    # ---- merged output head: cols [0:256)=feat, [256:280)=pose3d, rest=0 ----
    head = jnp.dot(h.astype(jnp.bfloat16),
                   w_ref[R_WHEAD:R_WHEAD + EMBED_DIM, 0:HEAD_P],
                   preferred_element_type=jnp.float32)
    head = head + b_ref[BI_HEAD:BI_HEAD + 1, 0:HEAD_P]             # (B, 384)

    # ---- pose2mesh first layer; the concat is done algebraically:
    #      pc @ W1 == pose2d @ W1_2d + head @ [W1_feat ; W1_3d/1000 ; 0]
    h1 = (jnp.dot(x16, w_ref[R_W1_2D:R_W1_2D + IN_DIM, 0:HIDDEN_P],
                  preferred_element_type=jnp.float32)
          + jnp.dot(head.astype(jnp.bfloat16),
                    w_ref[R_W1_HP:R_W1_HP + HEAD_P, 0:HIDDEN_P],
                    preferred_element_type=jnp.float32)
          + b_ref[BI_1:BI_1 + 1, 0:HIDDEN_P])
    h1 = jnp.maximum(h1, 0.0)                                      # (B, 128)

    # ---- pose2mesh output layer (N padded to 128 lanes) ----
    mesh = (jnp.dot(h1.astype(jnp.bfloat16),
                    w_ref[R_W2:R_W2 + HIDDEN_P, 0:MESH_P],
                    preferred_element_type=jnp.float32)
            + b_ref[BI_2:BI_2 + 1, 0:MESH_P])                      # (B, 128)

    # ---- lane-dense output slab (two full-lane-tile stores) ----
    out_ref[:, 0:MESH_P] = mesh
    out_ref[:, MESH_P:OUT_SLAB] = head[:, FEAT_DIM:HEAD_P]


# ------------------------------ wrapper --------------------------------------
@jax.jit
def graphormer_forward(pose2d, w_blob, b_blob):
    """Mirrors GraphormerNet.forward -> (cam_mesh, pose3d)."""
    bsz = pose2d.shape[0]
    x_flat = pose2d.reshape(bsz, -1)                               # pose2d.view(B, -1)
    out = pl.pallas_call(
        graphormer_fused_kernel,
        out_shape=jax.ShapeDtypeStruct((bsz, OUT_SLAB), jnp.float32),
        in_specs=[pl.BlockSpec(memory_space=pltpu.MemorySpace.VMEM)] * 3,
        out_specs=pl.BlockSpec(memory_space=pltpu.MemorySpace.VMEM),
        # TODO(synk): once batch >> 8, add grid=(bsz // TILE_B,) with
        # dimension_semantics=("parallel",) so v7x's two TensorCores split it.
    )(x_flat, w_blob, b_blob)
    cam_mesh = out[:, 0:MESH_DIM].reshape(bsz, NUM_VERTS, 3)
    pose3d = out[:, MESH_P:MESH_P + POSE3D_DIM].reshape(-1, NUM_JOINT, 3)
    return cam_mesh, pose3d


# --------------------------- deterministic params ----------------------------
def init_params():
    key = jax.random.PRNGKey(0)
    ks = jax.random.split(key, 12)

    def dense(k, fan_in, shape):
        return (jax.random.normal(k, shape, jnp.float32)
                * (1.0 / jnp.sqrt(jnp.float32(fan_in))))

    def bias(k, shape):
        return 0.1 * jax.random.normal(k, shape, jnp.float32)

    return {
        "w_in":   dense(ks[0], IN_DIM, (IN_DIM, EMBED_DIM)),
        "b_in":   bias(ks[1], (EMBED_DIM,)),
        "w_h":    dense(ks[2], EMBED_DIM, (DEPTH, EMBED_DIM, EMBED_DIM)),
        "b_h":    bias(ks[3], (DEPTH, EMBED_DIM)),
        "w_pose": dense(ks[4], EMBED_DIM, (EMBED_DIM, POSE3D_DIM)),
        "b_pose": bias(ks[5], (POSE3D_DIM,)),
        "w_feat": dense(ks[6], EMBED_DIM, (EMBED_DIM, FEAT_DIM)),
        "b_feat": bias(ks[7], (FEAT_DIM,)),
        "w1":     dense(ks[8], COMBINE_DIM, (COMBINE_DIM, HIDDEN_MESH)),
        "b1":     bias(ks[9], (HIDDEN_MESH,)),
        "w2":     dense(ks[10], HIDDEN_MESH, (HIDDEN_MESH, MESH_DIM)),
        "b2":     bias(ks[11], (MESH_DIM,)),
    }


def pack_params(p):
    """Pack all params into one bf16 weight blob + one f32 bias blob (done once)."""
    # Split the interleaved pose2mesh first-layer weight (296, H) into the row
    # groups that multiply pose2d / pose3d / feat; fold the /1000 into the
    # pose3d group so the kernel never divides.
    base = jnp.arange(NUM_JOINT) * COMBINE_C
    rows_2d = (base[:, None] + jnp.arange(2)[None, :]).reshape(-1)
    rows_3d = (base[:, None] + 2 + jnp.arange(3)[None, :]).reshape(-1)
    rows_ft = (base[:, None] + 5 + jnp.arange(EMBED_DIM)[None, :]).reshape(-1)
    w1_2d = p["w1"][rows_2d]                       # (16, H)
    w1_3d = p["w1"][rows_3d]                       # (24, H)
    w1_ft = p["w1"][rows_ft]                       # (256, H)

    wb = jnp.zeros((W_ROWS, W_COLS), jnp.float32)
    wb = wb.at[R_WIN:R_WIN + IN_DIM, 0:EMBED_DIM].set(p["w_in"])
    for d in range(DEPTH):
        r = R_WH + d * WH_BLK
        wb = wb.at[r:r + EMBED_DIM, 0:EMBED_DIM].set(p["w_h"][d])
    # merged lifter head: [w_feat | w_pose | 0]
    wb = wb.at[R_WHEAD:R_WHEAD + EMBED_DIM, 0:FEAT_DIM].set(p["w_feat"])
    wb = wb.at[R_WHEAD:R_WHEAD + EMBED_DIM,
               FEAT_DIM:FEAT_DIM + POSE3D_DIM].set(p["w_pose"])
    # mesh first layer, rows aligned with the merged-head column layout
    wb = wb.at[R_W1_2D:R_W1_2D + IN_DIM, 0:HIDDEN_MESH].set(w1_2d)
    wb = wb.at[R_W1_HP:R_W1_HP + FEAT_DIM, 0:HIDDEN_MESH].set(w1_ft)
    wb = wb.at[R_W1_HP + FEAT_DIM:R_W1_HP + FEAT_DIM + POSE3D_DIM,
               0:HIDDEN_MESH].set(w1_3d / 1000.0)
    # mesh output layer
    wb = wb.at[R_W2:R_W2 + HIDDEN_MESH, 0:MESH_DIM].set(p["w2"])

    bb = jnp.zeros((B_ROWS, W_COLS), jnp.float32)
    bb = bb.at[BI_IN, 0:EMBED_DIM].set(p["b_in"])
    for d in range(DEPTH):
        bb = bb.at[BI_H0 + d, 0:EMBED_DIM].set(p["b_h"][d])
    bb = bb.at[BI_HEAD, 0:FEAT_DIM].set(p["b_feat"])
    bb = bb.at[BI_HEAD, FEAT_DIM:FEAT_DIM + POSE3D_DIM].set(p["b_pose"])
    bb = bb.at[BI_1, 0:HIDDEN_MESH].set(p["b1"])
    bb = bb.at[BI_2, 0:MESH_DIM].set(p["b2"])

    return wb.astype(jnp.bfloat16), bb


def reference_forward(pose2d, p):
    """Pure-JAX f32 reference mirroring the unfused GraphormerNet.forward."""
    bsz = pose2d.shape[0]
    x = pose2d.reshape(bsz, -1)
    h = jnp.maximum(x @ p["w_in"] + p["b_in"], 0.0)
    for d in range(DEPTH):
        h = jnp.maximum(h @ p["w_h"][d] + p["b_h"][d], 0.0)
    pose3d = (h @ p["w_pose"] + p["b_pose"]).reshape(-1, NUM_JOINT, 3)
    feat = (h @ p["w_feat"] + p["b_feat"]).reshape(bsz, NUM_JOINT, EMBED_DIM)
    pose_combine = jnp.concatenate([pose2d, pose3d / 1000.0, feat], axis=2)
    pc = pose_combine.reshape(bsz, -1)
    h1 = jnp.maximum(pc @ p["w1"] + p["b1"], 0.0)
    mesh = (h1 @ p["w2"] + p["b2"]).reshape(bsz, NUM_VERTS, 3)
    return mesh, pose3d


# ---------------------------------- main -------------------------------------
if __name__ == "__main__":
    key = jax.random.PRNGKey(0)
    pose2d = jax.random.normal(key, (B, NUM_JOINT, 2), jnp.float32)

    params = init_params()
    w_blob, b_blob = pack_params(params)

    cam_mesh, pose3d = graphormer_forward(pose2d, w_blob, b_blob)
    jax.block_until_ready((cam_mesh, pose3d))

    assert cam_mesh.shape == (B, NUM_VERTS, 3)
    assert pose3d.shape == (B, NUM_JOINT, 3)

    # Validate the fusion / head merge / /1000 fold / packing offsets against
    # the unfused f32 reference (loose tol: kernel matmuls use bf16 inputs).
    ref_mesh, ref_pose3d = reference_forward(pose2d, params)
    assert jnp.allclose(pose3d, ref_pose3d, atol=1e-1, rtol=1e-1)
    assert jnp.allclose(cam_mesh, ref_mesh, atol=2e-1, rtol=1e-1)

    print("KERNEL_OK")
</pallas_src>

<mosaic_0001>
module attributes {stable_mosaic.version = 11 : i64} {
  func.func @graphormer_fused_kernel(%arg0: memref<2x16xf32, #tpu.memory_space<vmem>>, %arg1: memref<640x384xbf16, #tpu.memory_space<vmem>>, %arg2: memref<8x384xf32, #tpu.memory_space<vmem>>, %arg3: memref<2x256xf32, #tpu.memory_space<vmem>>) attributes {dimension_semantics = [], scalar_prefetch = 0 : i64, scratch_operands = 0 : i64, tpu.core_type = #tpu.core_type<tc>} {
    %c0 = arith.constant 0 : index
    %c0_0 = arith.constant 0 : index
    %0 = vector.load %arg0[%c0, %c0_0] : memref<2x16xf32, #tpu.memory_space<vmem>>, vector<2x16xf32>
    %1 = arith.truncf %0 : vector<2x16xf32> to vector<2x16xbf16>
    %c0_1 = arith.constant 0 : index
    %c0_2 = arith.constant 0 : index
    %2 = vector.load %arg1[%c0_1, %c0_2] : memref<640x384xbf16, #tpu.memory_space<vmem>>, vector<16x32xbf16>
    %cst = arith.constant dense<0.000000e+00> : vector<2x32xf32>
    %3 = tpu.matmul %1, %2, %cst {dimension_numbers = #tpu.dot_dimension_numbers<[1], [0], [0], [1], [0, 0, 1, 1], [], []>} : vector<2x16xbf16>, vector<16x32xbf16>, vector<2x32xf32> -> vector<2x32xf32>
    %c0_3 = arith.constant 0 : index
    %c0_4 = arith.constant 0 : index
    %4 = vector.load %arg2[%c0_3, %c0_4] : memref<8x384xf32, #tpu.memory_space<vmem>>, vector<1x32xf32>
    %5 = vector.broadcast %4 : vector<1x32xf32> to vector<2x32xf32>
    %6 = arith.addf %3, %5 : vector<2x32xf32>
    %cst_5 = arith.constant 0.000000e+00 : f32
    %7 = vector.broadcast %cst_5 : f32 to vector<2x32xf32>
    %8 = arith.maximumf %6, %7 : vector<2x32xf32>
    %9 = arith.truncf %8 : vector<2x32xf32> to vector<2x32xbf16>
    %c16 = arith.constant 16 : index
    %c0_6 = arith.constant 0 : index
    %10 = vector.load %arg1[%c16, %c0_6] : memref<640x384xbf16, #tpu.memory_space<vmem>>, vector<32x32xbf16>
    %cst_7 = arith.constant dense<0.000000e+00> : vector<2x32xf32>
    %11 = tpu.matmul %9, %10, %cst_7 {dimension_numbers = #tpu.dot_dimension_numbers<[1], [0], [0], [1], [0, 0, 1, 1], [], []>} : vector<2x32xbf16>, vector<32x32xbf16>, vector<2x32xf32> -> vector<2x32xf32>
    %c1 = arith.constant 1 : index
    %c0_8 = arith.constant 0 : index
    %12 = vector.load %arg2[%c1, %c0_8] : memref<8x384xf32, #tpu.memory_space<vmem>>, vector<1x32xf32>
    %13 = vector.broadcast %12 : vector<1x32xf32> to vector<2x32xf32>
    %14 = arith.addf %11, %13 : vector<2x32xf32>
    %cst_9 = arith.constant 0.000000e+00 : f32
    %15 = vector.broadcast %cst_9 : f32 to vector<2x32xf32>
    %16 = arith.maximumf %14, %15 : vector<2x32xf32>
    %17 = arith.truncf %16 : vector<2x32xf32> to vector<2x32xbf16>
    %c48 = arith.constant 48 : index
    %c0_10 = arith.constant 0 : index
    %18 = vector.load %arg1[%c48, %c0_10] : memref<640x384xbf16, #tpu.memory_space<vmem>>, vector<32x32xbf16>
    %cst_11 = arith.constant dense<0.000000e+00> : vector<2x32xf32>
    %19 = tpu.matmul %17, %18, %cst_11 {dimension_numbers = #tpu.dot_dimension_numbers<[1], [0], [0], [1], [0, 0, 1, 1], [], []>} : vector<2x32xbf16>, vector<32x32xbf16>, vector<2x32xf32> -> vector<2x32xf32>
    %c2 = arith.constant 2 : index
    %c0_12 = arith.constant 0 : index
    %20 = vector.load %arg2[%c2, %c0_12] : memref<8x384xf32, #tpu.memory_space<vmem>>, vector<1x32xf32>
    %21 = vector.broadcast %20 : vector<1x32xf32> to vector<2x32xf32>
    %22 = arith.addf %19, %21 : vector<2x32xf32>
    %cst_13 = arith.constant 0.000000e+00 : f32
    %23 = vector.broadcast %cst_13 : f32 to vector<2x32xf32>
    %24 = arith.maximumf %22, %23 : vector<2x32xf32>
    %25 = arith.truncf %24 : vector<2x32xf32> to vector<2x32xbf16>
    %c80 = arith.constant 80 : index
    %c0_14 = arith.constant 0 : index
    %26 = vector.load %arg1[%c80, %c0_14] : memref<640x384xbf16, #tpu.memory_space<vmem>>, vector<32x384xbf16>
    %cst_15 = arith.constant dense<0.000000e+00> : vector<2x384xf32>
    %27 = tpu.matmul %25, %26, %cst_15 {dimension_numbers = #tpu.dot_dimension_numbers<[1], [0], [0], [1], [0, 0, 1, 1], [], []>} : vector<2x32xbf16>, vector<32x384xbf16>, vector<2x384xf32> -> vector<2x384xf32>
    %c3 = arith.constant 3 : index
    %c0_16 = arith.constant 0 : index
    %28 = vector.load %arg2[%c3, %c0_16] : memref<8x384xf32, #tpu.memory_space<vmem>>, vector<1x384xf32>
    %29 = vector.broadcast %28 : vector<1x384xf32> to vector<2x384xf32>
    %30 = arith.addf %27, %29 : vector<2x384xf32>
    %c112 = arith.constant 112 : index
    %c0_17 = arith.constant 0 : index
    %31 = vector.load %arg1[%c112, %c0_17] : memref<640x384xbf16, #tpu.memory_space<vmem>>, vector<16x128xbf16>
    %cst_18 = arith.constant dense<0.000000e+00> : vector<2x128xf32>
    %32 = tpu.matmul %1, %31, %cst_18 {dimension_numbers = #tpu.dot_dimension_numbers<[1], [0], [0], [1], [0, 0, 1, 1], [], []>} : vector<2x16xbf16>, vector<16x128xbf16>, vector<2x128xf32> -> vector<2x128xf32>
    %33 = arith.truncf %30 : vector<2x384xf32> to vector<2x384xbf16>
    %c128 = arith.constant 128 : index
    %c0_19 = arith.constant 0 : index
    %34 = vector.load %arg1[%c128, %c0_19] : memref<640x384xbf16, #tpu.memory_space<vmem>>, vector<384x128xbf16>
    %cst_20 = arith.constant dense<0.000000e+00> : vector<2x128xf32>
    %35 = tpu.matmul %33, %34, %cst_20 {dimension_numbers = #tpu.dot_dimension_numbers<[1], [0], [0], [1], [0, 0, 1, 1], [], []>} : vector<2x384xbf16>, vector<384x128xbf16>, vector<2x128xf32> -> vector<2x128xf32>
    %36 = arith.addf %32, %35 : vector<2x128xf32>
    %c4 = arith.constant 4 : index
    %c0_21 = arith.constant 0 : index
    %37 = vector.load %arg2[%c4, %c0_21] : memref<8x384xf32, #tpu.memory_space<vmem>>, vector<1x128xf32>
    %38 = vector.broadcast %37 : vector<1x128xf32> to vector<2x128xf32>
    %39 = arith.addf %36, %38 : vector<2x128xf32>
    %cst_22 = arith.constant 0.000000e+00 : f32
    %40 = vector.broadcast %cst_22 : f32 to vector<2x128xf32>
    %41 = arith.maximumf %39, %40 : vector<2x128xf32>
    %42 = arith.truncf %41 : vector<2x128xf32> to vector<2x128xbf16>
    %c512 = arith.constant 512 : index
    %c0_23 = arith.constant 0 : index
    %43 = vector.load %arg1[%c512, %c0_23] : memref<640x384xbf16, #tpu.memory_space<vmem>>, vector<128x128xbf16>
    %cst_24 = arith.constant dense<0.000000e+00> : vector<2x128xf32>
    %44 = tpu.matmul %42, %43, %cst_24 {dimension_numbers = #tpu.dot_dimension_numbers<[1], [0], [0], [1], [0, 0, 1, 1], [], []>} : vector<2x128xbf16>, vector<128x128xbf16>, vector<2x128xf32> -> vector<2x128xf32>
    %c5 = arith.constant 5 : index
    %c0_25 = arith.constant 0 : index
    %45 = vector.load %arg2[%c5, %c0_25] : memref<8x384xf32, #tpu.memory_space<vmem>>, vector<1x128xf32>
    %46 = vector.broadcast %45 : vector<1x128xf32> to vector<2x128xf32>
    %47 = arith.addf %44, %46 : vector<2x128xf32>
    %c0_26 = arith.constant 0 : index
    %c0_27 = arith.constant 0 : index
    %48 = vector.load %arg3[%c0_26, %c0_27] : memref<2x256xf32, #tpu.memory_space<vmem>>, vector<2x128xf32>
    tpu.vector_store %arg3[%c0_26, %c0_27], %47 {strides = array<i32>} : memref<2x256xf32, #tpu.memory_space<vmem>>, vector<2x128xf32>,
    %49 = vector.extract_strided_slice %30 {offsets = [0, 256], sizes = [2, 128], strides = [1, 1]} : vector<2x384xf32> to vector<2x128xf32>
    %c0_28 = arith.constant 0 : index
    %c128_29 = arith.constant 128 : index
    %50 = vector.load %arg3[%c0_28, %c128_29] : memref<2x256xf32, #tpu.memory_space<vmem>>, vector<2x128xf32>
    tpu.vector_store %arg3[%c0_28, %c128_29], %49 {strides = array<i32>} : memref<2x256xf32, #tpu.memory_space<vmem>>, vector<2x128xf32>,
    return
  }
}

</mosaic_0001>

<bundles_post_ra>
// kernel: graphormer_forward.1
= control target key start
LH: loop header
LB: loop body
LE: loop exit
PB: predicated region body
PF: predicated region fallthrough
CT: control target
= control target key end

     0   :  { %8 = vsyncpa [#allocation3], 0  ;;  %s1048_s12 = smov [#allocation2]   ;;  %s1161_s0 = inlined_call_operand.vmem [shape: f32[2,16], index: 0, kind: input, shape index: {}]   ;;  %s1162_s1 = inlined_call_operand.hbm [shape: bf16[640,384], index: 1, kind: input, shape index: {}]   ;;  %s1163_s2 = inlined_call_operand.vmem [shape: f32[8,384], index: 2, kind: input, shape index: {}]   ;;  %s1164_s3 = inlined_call_operand.vmem [shape: f32[2,256], index: 3, kind: output, shape index: {}]  }
   0x1   :  { %s16_s13 = sshll.u32 %s1048_s12, 4  ;;  %s1024_s16 = scalar_lea.hbm %s1162_s1, 15360  ;;  %s17_s13 = int_to_ptr.vmem [resolvable:$true] %s16_s13 }
   0x2   :  { %p1025_p0 = scmp.ne.s32.totalorder %s1162_s1, %s1024_s16  ;;  %p1028_p1 = scmp.lt.u32.totalorder %s1024_s16, %s1162_s1 }
   0x4   :  { %p1030_p2 = pnand %p1028_p1, %p1025_p0 }
   0x6   :  { %1033 = shalt.err (!%p1030_p2)
}
   0x7   :  { %s1034_s21 = scalar_lea.vmem %s17_s13, 15360  ;;  %p1039_p4 = scmp.lt.s32.totalorder %s17_s13, %s17_s13 }
   0x8   :  { %p1035_p3 = scmp.ne.s32.totalorder %s17_s13, %s1034_s21  ;;  %p1040_p5 = scmp.lt.s32.totalorder %s1034_s21, %s1034_s21 }
   0xa   :  { %p1041_p6 = por %p1040_p5, %p1039_p4 }
   0xc   :  { %p1042_p7 = pnand %p1041_p6, %p1035_p3 }
   0xe   :  { %1045 = shalt.err (!%p1042_p7)
}
   0xf   :  { %s1049_s22 = smov 192   ;;  %s1050_s23 = smov 12  }
  0x10   :  { %22 = dma.hbm_to_vmem [thread:$0]  %s1162_s1, 15360, %s17_s13, [#allocation3], %s1049_s22, %s1049_s22, %s1050_s23  }
  0x11   :  { %1046 = dma.done.wait [#allocation3], 15360  }
  0x12   :  { %1047 = vsyncadd [#allocation3], 4294951936  ;;  %v1051_v0 = vmov 0.0   ;;  %vm1052_vm0 = vmmov 0   ;;  %v978_v1 = vld [vmem:[#allocation2] ss:$12 sps:$4 sm:$0xff]   ;;  %v222_v63 = vlaneseq }
  0x13   :  { %896 = vmatprep.subr.bf16.mxu1 %v1051_v0  ;;  %898 = vmatprep.mubr.msk.bf16.mxu1 %vm1052_vm0, %v1051_v0  ;;  %v29_v2 = vld [vmem:[%s1161_s0] sm:$0x3]  ;;  %vm40_vm1 = vcmask 130048   ;;  %v979_v4 = vld [vmem:[#allocation2 + $0x18] ss:$12 sps:$4 sm:$0xff]   ;;  %vm103_vm2 = vcmask 261120  }
  0x14   :  { %918 = vmatprep.subr.bf16.mxu0 %v1051_v0  ;;  %922 = vmatprep.mubr.msk.bf16.mxu0 %vm1052_vm0, %v1051_v0  ;;  %v1095_v3 = vpack.c.bf16 %v29_v2, %v29_v2  ;;  %v980_v5 = vld [vmem:[#allocation2 + $0x30] ss:$12 sps:$4 sm:$0xff]   ;;  %v33_v6 = vld [vmem:[%s1163_s2] ss:$0 sm:$0xff]  ;;  %v981_v13 = vld [vmem:[#allocation2 + $0x48] ss:$12 sps:$4 sm:$0xff]  }
  0x15   :  { %897 = vmatpush3.bf16.msra.mxu1 %v978_v1  ;;  %v982_v15 = vld [vmem:[#allocation2 + $0x60] ss:$12 sps:$4 sm:$0xff]   ;;  %v985_v16 = vld [vmem:[#allocation2 + $0x7c] ss:$12 sps:$4 sm:$0xff]   ;;  %v983_v24 = vld [vmem:[#allocation2 + $0x78] ss:$12 sps:$4 sm:$0xff]  }
  0x16   :  { %902 = vmatprep.subr.bf16.mxu1 %v1051_v0  ;;  %v90_v17 = vld [vmem:[%s1163_s2 + $0x1] ss:$0 sm:$0xff]  ;;  %v987_v28 = vld [vmem:[#allocation2 + $0x90] ss:$12 sps:$4 sm:$0xff]   ;;  %v990_v29 = vld [vmem:[#allocation2 + $0x98] ss:$12 sps:$4 sm:$0xff]  }
  0x17   :  { %v986_v26 = vld [vmem:[#allocation2 + $0x80] ss:$12 sps:$4 sm:$0xff]   ;;  %v1053_v30 = vmov 0   ;;  %v994_v42 = vld [vmem:[#allocation2 + $0x198] ss:$12 sps:$4 sm:$0xff]   ;;  %v223_v1 = vshrl.u32 %v222_v63, 7 }
  0x18   :  { %899 = vmatmul.mubr.msk.bf16.vlgmr.msra.gmra.mrb[0].mxu1 %vm40_vm1, %v1095_v3  ;;  %919 = vmatpush3.bf16.msra.mxu0 %v986_v26  ;;  %v989_v27 = vld [vmem:[#allocation2 + $0x94] ss:$12 sps:$4 sm:$0xff]   ;;  %v995_v43 = vld [vmem:[#allocation2 + $0x258] ss:$12 sps:$4 sm:$0xff]   ;;  %v997_v45 = vld [vmem:[#allocation2 + $0x1b0] ss:$12 sps:$4 sm:$0xff]  }
  0x19   :  { %903 = vmatpush3.bf16.msra.mxu1 %v979_v4  ;;  %906 = vmatprep.mubr.msk.bf16.mxu1 %vm1052_vm0, %v1051_v0  ;;  %v991_v31 = vld [vmem:[#allocation2 + $0x180] ss:$12 sps:$4 sm:$0xff]   ;;  %v996_v44 = vld [vmem:[#allocation2 + $0xd8] ss:$12 sps:$4 sm:$0xff]   ;;  %v998_v46 = vld [vmem:[#allocation2 + $0x270] ss:$12 sps:$4 sm:$0xff]  }
  0x1a   :  { %904 = vmatprep.subr.bf16.mxu1 %v1051_v0  ;;  %920 = vmatprep.subr.bf16.mxu0 %v1051_v0  ;;  %v153_v32 = vld [vmem:[%s1163_s2 + $0x2] ss:$0 sm:$0xff]  ;;  %v999_v47 = vld [vmem:[#allocation2 + $0xf0] ss:$12 sps:$4 sm:$0xff]   ;;  %v1000_v48 = vld [vmem:[#allocation2 + $0x1c8] ss:$12 sps:$4 sm:$0xff]  }
  0x1b   :  { %v992_v39 = vld [vmem:[#allocation2 + $0x240] ss:$12 sps:$4 sm:$0xff]   ;;  %v1001_v49 = vld [vmem:[#allocation2 + $0x288] ss:$12 sps:$4 sm:$0xff]   ;;  %v1006_v54 = vld [vmem:[#allocation2 + $0x1f8] ss:$12 sps:$4 sm:$0xff]  }
  0x1c   :  { %921 = vmatpush3.bf16.msra.mxu0 %v990_v29  ;;  %v993_v40 = vld [vmem:[#allocation2 + $0xc0] ss:$12 sps:$4 sm:$0xff]   ;;  %v1002_v50 = vld [vmem:[#allocation2 + $0x108] ss:$12 sps:$4 sm:$0xff]   ;;  %v1007_v55 = vld [vmem:[#allocation2 + $0x2b8] ss:$12 sps:$4 sm:$0xff]  }
  0x1d   :  { %905 = vmatpush3.bf16.msra.mxu1 %v980_v5  ;;  %926 = vmatprep.subr.bf16.mxu0 %v1051_v0  ;;  %v1003_v51 = vld [vmem:[#allocation2 + $0x1e0] ss:$12 sps:$4 sm:$0xff]   ;;  %v1008_v56 = vld [vmem:[#allocation2 + $0x138] ss:$12 sps:$4 sm:$0xff]   ;;  %v1009_v57 = vld [vmem:[#allocation2 + $0x210] ss:$12 sps:$4 sm:$0xff]  }
  0x1e   :  { %910 = vmatprep.subr.bf16.mxu1 %v1051_v0  ;;  %v1004_v52 = vld [vmem:[#allocation2 + $0x2a0] ss:$12 sps:$4 sm:$0xff]   ;;  %v1010_v58 = vld [vmem:[#allocation2 + $0x2d0] ss:$12 sps:$4 sm:$0xff]   ;;  %v1013_v60 = vld [vmem:[#allocation2 + $0x2e8] ss:$12 sps:$4 sm:$0xff]  }
  0x1f   :  { %v1005_v53 = vld [vmem:[#allocation2 + $0x120] ss:$12 sps:$4 sm:$0xff]   ;;  %v1011_v59 = vld [vmem:[#allocation2 + $0x150] ss:$12 sps:$4 sm:$0xff]   ;;  %v1012_v61 = vld [vmem:[#allocation2 + $0x228] ss:$12 sps:$4 sm:$0xff]  }
  0x20   :  { %v1014_v62 = vld [vmem:[#allocation2 + $0x168] ss:$12 sps:$4 sm:$0xff]   ;;  %v224_v2 = vsub.s32 0, %v223_v1  ;;  %v232_v4 = vsub.s32 2, %v223_v1  ;;  %v1017_v26 = vld [vmem:[#allocation2 + $0x318] ss:$12 sps:$4 sm:$0xff]  }
  0x21   :  { %v800_v5 = vld [vmem:[%s1163_s2 + $0x3] ss:$8 sm:$0x7] }
  0x22   :  { %v1020_v29 = vld [vmem:[#allocation2 + $0x360] ss:$12 sps:$4 sm:$0xff]  }
  0xeb   :  { %v78_v7 = vpop.f32.mrb[0].mxu1 }
  0xec   :  { %v79_v8 = vadd.f32 %v78_v7, %v33_v6  ;;  %v900_v9 = vpop.f32.mrb[1].mxu1  ;;  %v228_v6 = vsub.s32 1, %v223_v1  ;;  %v225_v7 = vrot.slane %v800_v5, %v224_v2 }
  0xed   :  { %v81_v10 = vpop.f32.mrb[2].mxu1 }
  0xee   :  { %v84_v11 = vmax.f32 %v79_v8, 0.0  ;;  %v901_v12 = vpop.f32.mrb[3].mxu1  ;;  %v233_v8 = vrot.slane %v800_v5, %v232_v4  ;;  %v229_v9 = vrot.slane %v800_v5, %v228_v6 }
  0xf0   :  { %v85_v14 = vpack.c.bf16 %v84_v11, %v84_v11 }
  0xf2   :  { %907 = vmatmul.mubr.msk.bf16.vlgmr.msra.gmra.mrb[4].mxu1 %vm103_vm2, %v85_v14 }
  0xf3   :  { %911 = vmatpush3.bf16.msra.mxu1 %v981_v13  ;;  %914 = vmatprep.mubr.msk.bf16.mxu1 %vm1052_vm0, %v1051_v0 }
  0xf4   :  { %912 = vmatprep.subr.bf16.mxu1 %v1051_v0 }
  0xf7   :  { %913 = vmatpush3.bf16.msra.mxu1 %v982_v15 }
  0xf8   :  { %272 = vmatprep.subr.bf16.mxu1 %v985_v16 }
 0x1c5   :  { %v141_v18 = vpop.f32.mrb[4].mxu1 }
 0x1c6   :  { %v142_v19 = vadd.f32 %v141_v18, %v90_v17  ;;  %v908_v20 = vpop.f32.mrb[5].mxu1 }
 0x1c7   :  { %v144_v21 = vpop.f32.mrb[6].mxu1 }
 0x1c8   :  { %v147_v22 = vmax.f32 %v142_v19, 0.0  ;;  %v909_v23 = vpop.f32.mrb[7].mxu1  ;;  %v1016_v19 = vld [vmem:[#allocation2 + $0x300] ss:$12 sps:$4 sm:$0xff]  }
 0x1ca   :  { %v148_v25 = vpack.c.bf16 %v147_v22, %v147_v22 }
 0x1cc   :  { %915 = vmatmul.mubr.msk.bf16.vlgmr.msra.gmra.mrb[8].mxu1 %vm103_vm2, %v148_v25 }
 0x1cd   :  { %273 = vmatpush1.bf16.msra.mxu1 %v983_v24  ;;  %304 = vmatprep.mubr.bf16.mxu1 %v1053_v30  ;;  %v1015_v24 = vld [vmem:[#allocation2 + $0xa8] ss:$12 sps:$4 sm:$0xff]   ;;  %v1021_v30 = vld [vmem:[#allocation2 + $0x378] ss:$12 sps:$4 sm:$0xff]  }
 0x1ce   :  { %274 = vmatprep.subr.bf16.mxu1 %v989_v27  ;;  %v1018_v27 = vld [vmem:[#allocation2 + $0x330] ss:$12 sps:$4 sm:$0xff]  }
 0x1d1   :  { %275 = vmatpush1.bf16.msra.mxu1 %v987_v28  ;;  %v1019_v28 = vld [vmem:[#allocation2 + $0x348] ss:$12 sps:$4 sm:$0xff]  }
 0x1d2   :  { %854 = vmatprep.subr.bf16.mxu1 %v991_v31  ;;  %v1022_v31 = vld [vmem:[#allocation2 + $0x390] ss:$12 sps:$4 sm:$0xff]  }
 0x29f   :  { %v203_v33 = vpop.f32.mrb[8].mxu1 }
 0x2a0   :  { %v204_v34 = vadd.f32 %v203_v33, %v153_v32  ;;  %v916_v35 = vpop.f32.mrb[9].mxu1  ;;  %v1023_v32 = vld [vmem:[#allocation2 + $0x3a8] ss:$12 sps:$4 sm:$0xff]  }
 0x2a1   :  { %v206_v36 = vpop.f32.mrb[10].mxu1 }
 0x2a2   :  { %v209_v37 = vmax.f32 %v204_v34, 0.0  ;;  %v917_v38 = vpop.f32.mrb[11].mxu1 }
 0x2a4   :  { %v210_v41 = vpack.c.bf16 %v209_v37, %v209_v37 }
 0x2a6   :  { %807 = vmatmul.mubr.msk.bf16.vlgmr.msra.gmra.mrb[12].mxu1 %vm103_vm2, %v210_v41  ;;  %923 = vmatmul.mubr.msk.bf16.vlgmr.msra.gmra.mrb[0].mxu0 %vm103_vm2, %v210_v41 }
 0x2a7   :  { %927 = vmatpush3.bf16.msra.mxu0 %v992_v39  ;;  %855 = vmatpush3.bf16.msra.mxu1 %v993_v40 }
 0x2a8   :  { %928 = vmatprep.subr.bf16.mxu0 %v1051_v0  ;;  %856 = vmatprep.subr.bf16.mxu1 %v994_v42 }
 0x2a9   :  { %942 = vmatprep.mubr.msk.bf16.mxu0 %vm1052_vm0, %v1051_v0 }
 0x2ab   :  { %929 = vmatpush3.bf16.msra.mxu0 %v995_v43  ;;  %857 = vmatpush3.bf16.msra.mxu1 %v996_v44  ;;  %v676_v43 = vld [vmem:[%s1163_s2 + $0x4] ss:$0 sm:$0xff] }
 0x2ac   :  { %930 = vmatprep.subr.bf16.mxu0 %v1051_v0  ;;  %858 = vmatprep.subr.bf16.mxu1 %v997_v45 }
 0x2af   :  { %931 = vmatpush3.bf16.msra.mxu0 %v998_v46  ;;  %859 = vmatpush3.bf16.msra.mxu1 %v999_v47 }
 0x2b0   :  { %932 = vmatprep.subr.bf16.mxu0 %v1051_v0  ;;  %860 = vmatprep.subr.bf16.mxu1 %v1000_v48 }
 0x2b3   :  { %933 = vmatpush3.bf16.msra.mxu0 %v1001_v49  ;;  %861 = vmatpush3.bf16.msra.mxu1 %v1002_v50  ;;  %v696_v50 = vld [vmem:[%s1163_s2 + $0x5] ss:$0 sm:$0xff] }
 0x2b4   :  { %934 = vmatprep.subr.bf16.mxu0 %v1051_v0  ;;  %862 = vmatprep.subr.bf16.mxu1 %v1003_v51 }
 0x2b7   :  { %935 = vmatpush3.bf16.msra.mxu0 %v1004_v52  ;;  %863 = vmatpush3.bf16.msra.mxu1 %v1005_v53 }
 0x2b8   :  { %936 = vmatprep.subr.bf16.mxu0 %v1051_v0  ;;  %864 = vmatprep.subr.bf16.mxu1 %v1006_v54 }
 0x2bb   :  { %937 = vmatpush3.bf16.msra.mxu0 %v1007_v55  ;;  %865 = vmatpush3.bf16.msra.mxu1 %v1008_v56 }
 0x2bc   :  { %938 = vmatprep.subr.bf16.mxu0 %v1051_v0  ;;  %866 = vmatprep.subr.bf16.mxu1 %v1009_v57 }
 0x2bf   :  { %939 = vmatpush3.bf16.msra.mxu0 %v1010_v58  ;;  %867 = vmatpush3.bf16.msra.mxu1 %v1011_v59 }
 0x2c0   :  { %940 = vmatprep.subr.bf16.mxu0 %v1051_v0  ;;  %868 = vmatprep.subr.bf16.mxu1 %v1012_v61 }
 0x2c3   :  { %941 = vmatpush3.bf16.msra.mxu0 %v1013_v60  ;;  %869 = vmatpush3.bf16.msra.mxu1 %v1014_v62 }
 0x2c4   :  { %952 = vmatprep.subr.bf16.mxu0 %v1051_v0  ;;  %946 = vmatprep.subr.bf16.mxu1 %v1051_v0 }
 0x379   :  { %v306_v10 = vpop.f32.mrb[12].mxu1  ;;  %v347_v11 = vpop.f32.mrb[0].mxu0 }
 0x37a   :  { %v307_v12 = vadd.f32 %v306_v10, %v225_v7  ;;  %v348_v13 = vadd.f32 %v347_v11, %v233_v8  ;;  %v308_v14 = vpop.f32.mrb[13].mxu1  ;;  %v924_v15 = vpop.f32.mrb[1].mxu0 }
 0x37b   :  { %v309_v16 = vadd.f32 %v308_v14, %v229_v9  ;;  %v310_v17 = vpop.f32.mrb[14].mxu1  ;;  %v350_v18 = vpop.f32.mrb[2].mxu0 }
 0x37c   :  { %v357_v20 = vpack.c.bf16 %v348_v13, %v348_v13  ;;  %786 = vst [vmem:[%s1164_s3 + $0x2] sm:$0x3] %v348_v13  ;;  %v311_v21 = vpop.f32.mrb[15].mxu1  ;;  %v925_v22 = vpop.f32.mrb[3].mxu0  ;;  %v355_v25 = vpack.c.bf16 %v307_v12, %v307_v12 }
 0x37d   :  { %v356_v23 = vpack.c.bf16 %v309_v16, %v309_v16 }
 0x37e   :  { %943 = vmatmul.mubr.bf16.vlgmr.msra.gmra.mrb[4].mxu0 %v357_v20 }
 0x37f   :  { %582 = vmatprep.mubr.bf16.mxu1 %v356_v23  ;;  %953 = vmatpush3.bf16.msra.mxu0 %v1016_v19 }
 0x380   :  { %583 = vmatmul.mubr.bf16.vlgmr.msra.gmra.mrb[16].mxu1 %v355_v25  ;;  %954 = vmatprep.subr.bf16.mxu0 %v1051_v0 }
 0x381   :  { %947 = vmatpush3.bf16.msra.mxu1 %v1015_v24  ;;  %948 = vmatprep.mubr.msk.bf16.mxu1 %vm1052_vm0, %v1051_v0 }
 0x382   :  { %968 = vmatprep.mubr.msk.bf16.mxu0 %vm1052_vm0, %v1051_v0 }
 0x383   :  { %955 = vmatpush3.bf16.msra.mxu0 %v1017_v26 }
 0x384   :  { %956 = vmatprep.subr.bf16.mxu0 %v1051_v0 }
 0x387   :  { %957 = vmatpush3.bf16.msra.mxu0 %v1018_v27 }
 0x388   :  { %949 = vmatmul.mubr.msk.bf16.vlgmr.msra.gmra.mrb[20].mxu1 %vm40_vm1, %v1095_v3  ;;  %958 = vmatprep.subr.bf16.mxu0 %v1051_v0 }
 0x38b   :  { %959 = vmatpush3.bf16.msra.mxu0 %v1019_v28 }
 0x38c   :  { %960 = vmatprep.subr.bf16.mxu0 %v1051_v0 }
 0x38f   :  { %961 = vmatpush3.bf16.msra.mxu0 %v1020_v29 }
 0x390   :  { %962 = vmatprep.subr.bf16.mxu0 %v1051_v0 }
 0x393   :  { %963 = vmatpush3.bf16.msra.mxu0 %v1021_v30 }
 0x394   :  { %964 = vmatprep.subr.bf16.mxu0 %v1051_v0 }
 0x397   :  { %965 = vmatpush3.bf16.msra.mxu0 %v1022_v31 }
 0x398   :  { %966 = vmatprep.subr.bf16.mxu0 %v1051_v0 }
 0x39b   :  { %967 = vmatpush3.bf16.msra.mxu0 %v1023_v32 }
 0x451   :  { %v624_v3 = vpop.f32.mrb[4].mxu0 }
 0x452   :  { %v944_v33 = vpop.f32.mrb[5].mxu0 }
 0x453   :  { %v870_v34 = vpop.f32.mrb[16].mxu1  ;;  %v627_v35 = vpop.f32.mrb[6].mxu0 }
 0x454   :  { %v871_v36 = vpop.f32.mrb[17].mxu1  ;;  %v945_v37 = vpop.f32.mrb[7].mxu0 }
 0x455   :  { %v872_v38 = vadd.f32 %v871_v36, %v870_v34  ;;  %v873_v39 = vpop.f32.mrb[18].mxu1 }
 0x456   :  { %v874_v40 = vpop.f32.mrb[19].mxu1 }
 0x457   :  { %v625_v41 = vadd.f32 %v872_v38, %v624_v3 }
 0x45b   :  { %v670_v42 = vpop.f32.mrb[20].mxu1 }
 0x45c   :  { %v671_v44 = vadd.f32 %v670_v42, %v625_v41  ;;  %v950_v45 = vpop.f32.mrb[21].mxu1 }
 0x45d   :  { %v673_v0 = vpop.f32.mrb[22].mxu1 }
 0x45e   :  { %v677_v46 = vadd.f32 %v676_v43, %v671_v44  ;;  %v951_v47 = vpop.f32.mrb[23].mxu1 }
 0x460   :  { %v678_v48 = vmax.f32 %v677_v46, 0.0 }
 0x462   :  { %v679_v49 = vpack.c.bf16 %v678_v48, %v678_v48 }
 0x464   :  { %969 = vmatmul.mubr.bf16.vlgmr.msra.gmra.mrb[8].mxu0 %v679_v49 }
 0x537   :  { %v779_v51 = vpop.f32.mrb[8].mxu0 }
 0x538   :  { %v780_v52 = vadd.f32 %v779_v51, %v696_v50  ;;  %v970_v53 = vpop.f32.mrb[9].mxu0 }
 0x539   :  { %v782_v54 = vpop.f32.mrb[10].mxu0 }
 0x53a   :  { %785 = vst [vmem:[%s1164_s3] sm:$0x3] %v780_v52  ;;  %v971_v55 = vpop.f32.mrb[11].mxu0 }
 0x53b   :  { %791 = vsyncpa [#allocation3], 1 }

</bundles_post_ra>
